<compile_context>
chip_gen: v7x
topology: tpu7x:2x2x1
jax: 0.10.0
libtpu: 0.0.40
codegen_flags: <defaults>
</compile_context>

<pallas_src>
import functools

import jax
import jax.numpy as jnp
from jax.experimental import pallas as pl
from jax.experimental.pallas import tpu as pltpu


def _layernorm_kernel(x_ref, gamma_ref, beta_ref, o_ref, *, eps):
    """Row-wise LayerNorm matching the PyTorch reference:
       (x - mean) / (std_unbiased + eps) * gamma + beta
    """
    x = x_ref[...].astype(jnp.float32)                 # (rows, D)
    d = x.shape[-1]
    mean = jnp.mean(x, axis=-1, keepdims=True)         # (rows, 1)
    centered = x - mean
    # PyTorch x.std(-1) is unbiased (divides by D-1); eps is added to std.
    var = jnp.sum(centered * centered, axis=-1, keepdims=True) / (d - 1)
    denom = jnp.sqrt(var) + eps                        # (rows, 1)
    # EUP approximate reciprocal + one Newton-Raphson step (tiny (rows,1) data)
    # -> f32-accurate, and the full-tile op below is a multiply, not a divide.
    inv = pl.reciprocal(denom, approx=True)
    inv = inv * (2.0 - denom * inv)
    gamma = gamma_ref[...]                             # (1, D), already f32
    beta = beta_ref[...]                               # (1, D), already f32
    o_ref[...] = (centered * inv * gamma + beta).astype(o_ref.dtype)


def _choose_row_tile(n_rows, d, itemsize, *, max_block_bytes=4 << 20,
                     max_rows=1024):
    """Pick a row tile: multiple of 8, <= ~4 MiB per block, <= 1024 rows,
    and (when possible) small enough that the grid has >= 2 steps so the
    parallel axis can shard across 2 TensorCores (v7x)."""
    padded_rows = -(-n_rows // 8) * 8
    rows_by_bytes = max(8, (max_block_bytes // max(1, d * itemsize)) // 8 * 8)
    tile = min(max_rows, rows_by_bytes, padded_rows)
    tile = max(8, (tile // 8) * 8)
    # Prefer >= 2 grid steps so the single grid axis can use both TCs on v7x.
    if padded_rows >= 16 and -(-padded_rows // tile) < 2:
        tile = max(8, (padded_rows // 2) // 8 * 8)
    return tile


def pallas_layernorm(x2d, gamma, beta, *, eps=1e-6, row_tile=None):
    """x2d: (R, D); gamma/beta: (D,)."""
    R, D = x2d.shape
    itemsize = jnp.dtype(x2d.dtype).itemsize
    if row_tile is None:
        row_tile = _choose_row_tile(R, D, itemsize)

    n_blocks = pl.cdiv(R, row_tile)
    padded_R = n_blocks * row_tile
    if padded_R != R:
        # Padded rows normalize to finite values (== beta) and are sliced off.
        x2d = jnp.pad(x2d, ((0, padded_R - R), (0, 0)))

    gamma2d = gamma.astype(jnp.float32).reshape(1, D)
    beta2d = beta.astype(jnp.float32).reshape(1, D)

    # Explicit VMEM budget: double-buffered in + out blocks, plus gamma/beta
    # and some margin. Clamped so it stays sane on v5e (16 MiB scoped default)
    # and within v7x's 64 MiB physical VMEM.
    vmem_bytes = 2 * 2 * row_tile * D * itemsize + 4 * D * 4 + (4 << 20)
    vmem_bytes = int(min(max(vmem_bytes, 8 << 20), 96 << 20))

    kernel = functools.partial(_layernorm_kernel, eps=eps)
    out = pl.pallas_call(
        kernel,
        out_shape=jax.ShapeDtypeStruct((padded_R, D), x2d.dtype),
        grid_spec=pltpu.PrefetchScalarGridSpec(
            num_scalar_prefetch=0,
            grid=(n_blocks,),
            in_specs=[
                pl.BlockSpec((row_tile, D), lambda i: (i, 0)),
                pl.BlockSpec((1, D), lambda i: (0, 0)),
                pl.BlockSpec((1, D), lambda i: (0, 0)),
            ],
            out_specs=pl.BlockSpec((row_tile, D), lambda i: (i, 0)),
        ),
        compiler_params=pltpu.CompilerParams(
            dimension_semantics=("parallel",),
            vmem_limit_bytes=vmem_bytes,
        ),
    )(x2d, gamma2d, beta2d)

    if padded_R != R:
        out = out[:R]
    return out


class EncoderPallas:
    """JAX/Pallas equivalent of Encoder(layer, N).

    Parameters (matching LayerNorm.__init__):
      train_mean: ones(d_model)   (scale / gamma)
      train_std : zeros(d_model)  (shift / beta)
    """

    def __init__(self, d_model, n_layers, eps=1e-6):
        self.d_model = d_model
        self.n_layers = n_layers
        self.eps = eps
        # Deterministic init identical to the PyTorch module; kept f32.
        self.train_mean = jnp.ones((d_model,), jnp.float32)
        self.train_std = jnp.zeros((d_model,), jnp.float32)

    def __call__(self, x, mask):
        # x: [B, S, D]
        B, S, D = x.shape
        assert D == self.d_model
        # The N cloned layers: the layer class is not defined in the reference
        # source, so they are applied as identity pass-throughs here.
        for _ in range(self.n_layers):
            x = x  # TODO(synk): replace with the real EncoderLayer forward once defined.
        # Final LayerNorm — the Pallas hot path.
        x2d = x.reshape(B * S, D)
        y2d = pallas_layernorm(x2d, self.train_mean, self.train_std, eps=self.eps)
        return y2d.reshape(B, S, D)


def _reference_layernorm(x, gamma, beta, eps=1e-6):
    """Pure-JAX reference of the PyTorch LayerNorm (unbiased std, eps on std).
    NOTE: intentionally NOT nn.LayerNorm semantics (which uses biased var and
    puts eps inside the sqrt)."""
    mean = jnp.mean(x, axis=-1, keepdims=True)
    centered = x - mean
    var = jnp.sum(centered * centered, axis=-1, keepdims=True) / (x.shape[-1] - 1)
    std = jnp.sqrt(var)
    return centered / (std + eps) * gamma + beta


if __name__ == "__main__":
    # d_model = 128 keeps the output last dim lane-dense (multiple of 128).
    B, S, D, N_LAYERS = 2, 8, 128, 2

    key = jax.random.PRNGKey(0)
    kx, km = jax.random.split(key)
    x = jax.random.normal(kx, (B, S, D), dtype=jnp.float32)
    mask = jnp.ones((B, 1, S), dtype=jnp.float32)  # unused by identity layers

    enc = EncoderPallas(d_model=D, n_layers=N_LAYERS)
    out = enc(x, mask)
    out = jax.block_until_ready(out)

    # Sanity check against a pure-JAX reference (approx recip + 1 NR step is
    # f32-accurate; tolerance left slightly loose).
    ref = _reference_layernorm(x, enc.train_mean, enc.train_std)
    assert out.shape == (B, S, D)
    assert jnp.allclose(out, ref, atol=1e-4, rtol=1e-4), "mismatch vs reference"

    print("KERNEL_OK")
</pallas_src>

<mosaic_0001>
module attributes {stable_mosaic.version = 11 : i64} {
  func.func @_layernorm_kernel(%arg0: i32, %arg1: memref<8x128xf32, #tpu.memory_space<vmem>>, %arg2: memref<1x128xf32, #tpu.memory_space<vmem>>, %arg3: memref<1x128xf32, #tpu.memory_space<vmem>>, %arg4: memref<8x128xf32, #tpu.memory_space<vmem>>) attributes {dimension_semantics = [#tpu.dimension_semantics<parallel>], iteration_bounds = array<i64: 2>, scalar_prefetch = 0 : i64, scratch_operands = 0 : i64, tpu.core_type = #tpu.core_type<tc>, window_params = [{transform_indices = @transform_0, window_bounds = array<i64: 8, 128>}, {pipeline_mode = #tpu.pipeline_mode<synchronous>, transform_indices = @transform_1, window_bounds = array<i64: 1, 128>}, {pipeline_mode = #tpu.pipeline_mode<synchronous>, transform_indices = @transform_2, window_bounds = array<i64: 1, 128>}, {transform_indices = @transform_3, window_bounds = array<i64: 8, 128>}]} {
    %c0 = arith.constant 0 : index
    %c0_0 = arith.constant 0 : index
    %0 = vector.load %arg1[%c0, %c0_0] : memref<8x128xf32, #tpu.memory_space<vmem>>, vector<8x128xf32>
    %cst = arith.constant dense<0.000000e+00> : vector<8xf32>
    %1 = vector.multi_reduction <add>, %0, %cst [1] : vector<8x128xf32> to vector<8xf32>
    %2 = vector.shape_cast %1 : vector<8xf32> to vector<8x1xf32>
    %cst_1 = arith.constant 1.280000e+02 : f32
    %3 = vector.broadcast %cst_1 : f32 to vector<8x1xf32>
    %4 = arith.divf %2, %3 : vector<8x1xf32>
    %5 = vector.broadcast %4 : vector<8x1xf32> to vector<8x128xf32>
    %6 = arith.subf %0, %5 : vector<8x128xf32>
    %7 = arith.mulf %6, %6 : vector<8x128xf32>
    %cst_2 = arith.constant dense<0.000000e+00> : vector<8xf32>
    %8 = vector.multi_reduction <add>, %7, %cst_2 [1] : vector<8x128xf32> to vector<8xf32>
    %9 = vector.shape_cast %8 : vector<8xf32> to vector<8x1xf32>
    %cst_3 = arith.constant 1.270000e+02 : f32
    %10 = vector.broadcast %cst_3 : f32 to vector<8x1xf32>
    %11 = arith.divf %9, %10 : vector<8x1xf32>
    %12 = math.sqrt %11 : vector<8x1xf32>
    %cst_4 = arith.constant 9.99999997E-7 : f32
    %13 = vector.broadcast %cst_4 : f32 to vector<8x1xf32>
    %14 = arith.addf %12, %13 : vector<8x1xf32>
    %15 = tpu.reciprocal %14 {approx = true} : vector<8x1xf32> -> vector<8x1xf32>
    %16 = arith.mulf %14, %15 : vector<8x1xf32>
    %cst_5 = arith.constant 2.000000e+00 : f32
    %17 = vector.broadcast %cst_5 : f32 to vector<8x1xf32>
    %18 = arith.subf %17, %16 : vector<8x1xf32>
    %19 = arith.mulf %15, %18 : vector<8x1xf32>
    %c0_6 = arith.constant 0 : index
    %c0_7 = arith.constant 0 : index
    %20 = vector.load %arg2[%c0_6, %c0_7] : memref<1x128xf32, #tpu.memory_space<vmem>>, vector<1x128xf32>
    %c0_8 = arith.constant 0 : index
    %c0_9 = arith.constant 0 : index
    %21 = vector.load %arg3[%c0_8, %c0_9] : memref<1x128xf32, #tpu.memory_space<vmem>>, vector<1x128xf32>
    %22 = vector.broadcast %19 : vector<8x1xf32> to vector<8x128xf32>
    %23 = arith.mulf %6, %22 : vector<8x128xf32>
    %24 = vector.broadcast %20 : vector<1x128xf32> to vector<8x128xf32>
    %25 = arith.mulf %23, %24 : vector<8x128xf32>
    %26 = vector.broadcast %21 : vector<1x128xf32> to vector<8x128xf32>
    %27 = arith.addf %25, %26 : vector<8x128xf32>
    %c0_10 = arith.constant 0 : index
    %c0_11 = arith.constant 0 : index
    %28 = vector.load %arg4[%c0_10, %c0_11] : memref<8x128xf32, #tpu.memory_space<vmem>>, vector<8x128xf32>
    tpu.vector_store %arg4[%c0_10, %c0_11], %27 {strides = array<i32>} : memref<8x128xf32, #tpu.memory_space<vmem>>, vector<8x128xf32>,
    return
  }
  func.func @transform_0(%arg0: i32) -> (i32, i32) {
    %c0_i32 = arith.constant 0 : i32
    %c0_i32_0 = arith.constant 0 : i32
    return %arg0, %c0_i32 : i32, i32
  }
  func.func @transform_1(%arg0: i32) -> (i32, i32) {
    %c0_i32 = arith.constant 0 : i32
    %c0_i32_0 = arith.constant 0 : i32
    %c0_i32_1 = arith.constant 0 : i32
    return %c0_i32, %c0_i32_0 : i32, i32
  }
  func.func @transform_2(%arg0: i32) -> (i32, i32) {
    %c0_i32 = arith.constant 0 : i32
    %c0_i32_0 = arith.constant 0 : i32
    %c0_i32_1 = arith.constant 0 : i32
    return %c0_i32, %c0_i32_0 : i32, i32
  }
  func.func @transform_3(%arg0: i32) -> (i32, i32) {
    %c0_i32 = arith.constant 0 : i32
    %c0_i32_0 = arith.constant 0 : i32
    return %arg0, %c0_i32 : i32, i32
  }
}

</mosaic_0001>

<bundles_post_ra>
// kernel: tpu_custom_call.1
= control target key start
LH: loop header
LB: loop body
LE: loop exit
PB: predicated region body
PF: predicated region fallthrough
CT: control target
= control target key end

     0   :  { %8 = vsyncpa [#allocation3], 0  ;;  %s666_s0 = inlined_call_operand.hbm [shape: f32[16,128], index: 0, kind: input, shape index: {}]   ;;  %s667_s1 = inlined_call_operand.vmem [shape: f32[1,128], index: 1, kind: input, shape index: {}]   ;;  %s668_s2 = inlined_call_operand.vmem [shape: f32[1,128], index: 2, kind: input, shape index: {}]   ;;  %s669_s3 = inlined_call_operand.hbm [shape: f32[16,128], index: 3, kind: output, shape index: {}]  }
   0x1   :  { %10 = vsyncpa [#allocation3 + $0x1], 0 }
   0x2   :  { %11 = vsyncpa [#allocation4], 0 }
   0x3   :  { %13 = vsyncpa [#allocation4 + $0x1], 0  ;;  %s495_s12 = smov 0   ;;  %s497_s13 = smov 0  }
   0x4   :  { %s499_s14 = smov 0   ;;  %s501_s15 = smov 0  }
   0x5 LB: > { %s516_s16 = sadd.s32 4294967295, %s471_s15   ;;  %s311_s17 = sadd.s32 4294967294, %s471_s15   ;;  %s471_s15 = sphi %s501_s15, %s684_s15   ;;  %s467_s14 = sphi %s499_s14, %s683_s14   ;;  %s463_s13 = sphi %s497_s13, %s682_s13   ;;  %s459_s12 = sphi %s495_s12, %s681_s12  }
   0x6   : > { %s520_s18 = sadd.s32 1, %s471_s15   ;;  %s26_s19 = sadd.s32 1, %s467_s14 }
   0x7   : > { %s23_s20 = ssub.s32 %s471_s15, %s520_s18  ;;  %p33_p0 = scmp.ne.s32.totalorder %s467_s14, %s463_s13 }
   0x8   : > { %p24_p1 = scmp.eq.s32.totalorder %s23_s20, 0  ;;  %p34_p2 = scmp.eq.s32.totalorder %s471_s15, 0 }
   0x9   : > { %p39_p3 = scmp.ne.s32.totalorder %s463_s13, %s459_s12  ;;  %p40_p4 = scmp.eq.s32.totalorder %s516_s16, 0 }
   0xa   : > { %s532_s21 = scalar_select %p24_p1, %s467_s14, %s26_s19  }
   0xb   : > { %p534_p5 = por %p34_p2, %p33_p0  ;;  %p538_p6 = por %p40_p4, %p39_p3 }
   0xc   : > { %p105_p7 = scmp.eq.s32.totalorder %s516_s16, 1  ;;  %p111_p8 = scmp.eq.s32.totalorder %s311_s17, 1 }
   0xd   : > { %p337_p10 = scmp.lt.s32.totalorder %s471_s15, 2  ;;  %s137_s26 = sand.u32 1, %s467_s14  }
   0xe   : > { %p545_p11 = por %p105_p7, %p33_p0  ;;  %p549_p12 = por %p111_p8, %p39_p3 }
   0xf   : > { %s315_s27 = sshll.u32 %s471_s15, 7  ;;  %s314_s28 = sshll.u32 %s137_s26, 3 }
  0x10   : > { %s673_s24 = scalar_select %p545_p11, 1, 0 }
  0x11   : > { %s674_s25 = scalar_select %p549_p12, 1, 0 }
  0x12   : > { %s558_s4 = scalar_lea.hbm %s666_s0, %s315_s27  ;;  %s141_s5 = scalar_lea.vmem [#allocation2], %s314_s28 }
  0x13   : > { %s148_s6 = sshll.u32 %s141_s5, 4  ;;  %p562_p13 = pnand %p337_p10, %p534_p5  ;;  %s566_s6 = int_to_ptr.vmem [resolvable:$true] %s148_s6 }
  0x14   : > { %s138_s8 = scalar_lea.sflag [#allocation3], %s137_s26  ;;  %s375_s9 = scalar_lea.hbm %s558_s4, 128 }
  0x15   : > { %p376_p2 = scmp.ne.s32.totalorder %s558_s4, %s375_s9  ;;  %p377_p3 = pneg %p562_p13 }
  0x16   : > { %s380_s17 = scalar_lea.hbm %s666_s0, 256  ;;  %p381_p5 = scmp.lt.u32.totalorder %s558_s4, %s666_s0 }
  0x17   : > { %p378_p4 = pnand %p377_p3, %p376_p2  ;;  %p382_p8 = scmp.lt.u32.totalorder %s380_s17, %s375_s9 }
  0x18   : > { %p384_p9 = scmp.lt.u32.totalorder %s375_s9, %s558_s4 }
  0x19   : > { %p379_p7 = pneg %p378_p4  ;;  %p383_p10 = por %p382_p8, %p381_p5 }
  0x1b   : > { %p385_p0 = por %p384_p9, %p383_p10 }
  0x1d   : > { %p386_p1 = pnand %p385_p0, %p379_p7 }
  0x1f   : > { %389 = shalt.err (!%p386_p1)
}
  0x20   : > { %s390_s22 = scalar_lea.vmem %s566_s6, 128  ;;  %s473_s26 = smov [#allocation2]  }
  0x21   : > { %p391_p2 = scmp.ne.s32.totalorder %s566_s6, %s390_s22  ;;  %s395_s27 = sshll.u32 %s473_s26, 4  ;;  %s396_s27 = int_to_ptr.vmem [resolvable:$false] %s395_s27 }
  0x22   : > { %s397_s28 = scalar_lea.vmem %s396_s27, 256  ;;  %p398_p11 = scmp.lt.s32.totalorder %s566_s6, %s396_s27 }
  0x23   : > { %p393_p4 = pnand %p391_p2, %p377_p3  ;;  %p399_p5 = scmp.lt.s32.totalorder %s397_s28, %s390_s22 }
  0x25   : > { %p394_p12 = pneg %p393_p4  ;;  %p400_p8 = por %p399_p5, %p398_p11 }
  0x27   : > { %p401_p9 = pnand %p400_p8, %p394_p12 }
  0x29   : > { %404 = shalt.err (!%p401_p9)
}
  0x2a   : > { %332 = dma.hbm_to_vmem [thread:$0]  (!%p562_p13), %s558_s4, 128, %s566_s6, %s138_s8  }
  0x2b   : > { %p676_p0 = scmp.lt.s32.totalorder %s471_s15, 3  ;;  %p677_p1 = scmp.ge.s32.totalorder %s471_s15, 1 }
  0x2d   : > { %p154_p3 = pnand %p677_p1, %p676_p0 }
  0x2e   : > { %s600_s29 = sand.u32 (!%p154_p3), 1, %s463_s13  }
  0x2f   : > { %157 = sbr.rel (%p154_p3) target bundleno = 402 (0x192), region = 32  ;;  %s317_s30 = sshll.u32 (!%p154_p3), %s600_s29, 3 }
  0x30   : > { %s160_s5 = scalar_lea.sflag (!%p154_p3), [#allocation3], %s600_s29  ;;  %s163_s7 = scalar_lea.vmem (!%p154_p3), [#allocation2], %s317_s30 }
  0x36   : > { %450 = dma.done.wait (%p538_p6), %s160_s5, 128  }
  0x37   : > { %452 = vsyncadd (%p538_p6), %s160_s5, 4294967168  ;;  %v186_v0 = vld [vmem:[%s163_s7] sm:$0xff]  ;;  %s322_s9 = sshll.u32 %s516_s16, 7  ;;  %s185_s10 = scalar_lea.vmem [#allocation5], %s317_s30 }
  0x38   : > { %187 = vadd.xlane.f32.xlu0 %v186_v0  ;;  %v319_v17 = vld [vmem:[%s667_s1] ss:$0 sm:$0xff]  ;;  %s241_s11 = sshll.u32 %s185_s10, 4  ;;  %s622_s20 = scalar_lea.hbm %s669_s3, %s322_s9  ;;  %s624_s11 = int_to_ptr.vmem [resolvable:$true] %s241_s11 }
  0x39   : > { %v320_v19 = vld [vmem:[%s668_s2] ss:$0 sm:$0xff]  ;;  %s228_s22 = scalar_lea.sflag [#allocation4], %s600_s29  ;;  %s405_s26 = scalar_lea.vmem %s624_s11, 128 }
  0x3a   : > { %p406_p6 = scmp.ne.s32.totalorder %s624_s11, %s405_s26  ;;  %p678_p11 = scmp.ne.s32.totalorder %s673_s24, 0 }
  0x3b   : > { %s474_s16 = smov [#allocation5]  }
  0x3c   : > { %p407_p12 = pnand %p406_p6, %p678_p11  ;;  %s409_s27 = sshll.u32 %s474_s16, 4  ;;  %s410_s27 = int_to_ptr.vmem [resolvable:$false] %s409_s27 }
  0x3d   : > { %s411_s28 = scalar_lea.vmem %s410_s27, 256  ;;  %p412_p7 = scmp.lt.s32.totalorder %s624_s11, %s410_s27 }
  0x3e   : > { %p408_p13 = pneg %p407_p12  ;;  %p413_p10 = scmp.lt.s32.totalorder %s411_s28, %s405_s26 }
  0x40   : > { %p414_p2 = por %p413_p10, %p412_p7 }
  0x42   : > { %p415_p4 = pnand %p414_p2, %p408_p13 }
  0xc5   : > { %v188_v1 = vpop.xlane.xlu0 %187 }
  0xc6   : > { %v190_v2 = vmul.f32 0.0078125, %v188_v1 }
  0xc8   : > { %v191_v3 = vsub.f32 %v186_v0, %v190_v2 }
  0xca   : > { %v192_v4 = vmul.f32 %v191_v3, %v191_v3 }
  0xcc   : > { %193 = vadd.xlane.f32.xlu0 %v192_v4 }
 0x159   : > { %v194_v5 = vpop.xlane.xlu0 %193 }
 0x15a   : > { %v196_v6 = vmul.f32 0.007874016, %v194_v5 }
 0x15c   : > { %371 = vrsqrt.f32 %v196_v6  ;;  %vm199_vm0 = vcmp.eq.f32.partialorder %v196_v6, inf  ;;  %v202_v9 = vand.u32 2147483648, %v196_v6  ;;  %vm201_vm1 = vcmp.eq.f32.partialorder %v196_v6, 0.0 }
 0x166   : > { %v372_v7 = vpop.eup %371 }
 0x167   : > { %v198_v8 = vmul.f32 %v372_v7, %v196_v6 }
 0x169   : > { %v200_v10 = vsel %vm199_vm0, %v196_v6, %v198_v8 }
 0x16a   : > { %v203_v11 = vsel %vm201_vm1, %v202_v9, %v200_v10 }
 0x16b   : > { %v204_v12 = vadd.f32 1e-06, %v203_v11 }
 0x16d   : > { %373 = vrcp.f32 %v204_v12 }
 0x177   : > { %v374_v13 = vpop.eup %373 }
 0x178   : > { %v206_v14 = vmul.f32 %v374_v13, %v204_v12 }
 0x17a   : > { %v207_v15 = vsub.f32 2.0, %v206_v14 }
 0x17c   : > { %v208_v16 = vmul.f32 %v374_v13, %v207_v15 }
 0x17e   : > { %v211_v18 = vmul.f32 %v208_v16, %v191_v3 }
 0x180   : > { %v218_v20 = vmul.f32 %v319_v17, %v211_v18 }
 0x182   : > { %v225_v21 = vadd.f32 %v320_v19, %v218_v20 }
 0x184   : > { %226 = vst [vmem:[%s185_s10] sm:$0xff] %v225_v21 }
 0x185   : > { %418 = shalt.err (!%p415_p4)
}
 0x186   : > { %s419_s29 = scalar_lea.hbm %s622_s20, 128  ;;  %s423_s7 = scalar_lea.hbm %s669_s3, 256 }
 0x187   : > { %p420_p5 = scmp.ne.s32.totalorder %s622_s20, %s419_s29  ;;  %p424_p0 = scmp.lt.u32.totalorder %s622_s20, %s669_s3 }
 0x188   : > { %p425_p1 = scmp.lt.u32.totalorder %s423_s7, %s419_s29  ;;  %p427_p6 = scmp.lt.u32.totalorder %s419_s29, %s622_s20 }
 0x189   : > { %p421_p8 = pnand %p420_p5, %p678_p11 }
 0x18a   : > { %p426_p3 = por %p425_p1, %p424_p0 }
 0x18b   : > { %p422_p9 = pneg %p421_p8 }
 0x18c   : > { %p428_p12 = por %p427_p6, %p426_p3 }
 0x18e   : > { %p429_p13 = pnand %p428_p12, %p422_p9 }
 0x190   : > { %432 = shalt.err (!%p429_p13)
}
 0x191   : > { %327 = dma.vmem_to_hbm [thread:$0]  (%p678_p11), %s624_s11, 128, %s622_s20, %s228_s22  }
 0x192 PF: > { %s253_s6 = sand.u32 1, %s459_s12   ;;  %p679_p7 = scmp.ne.s32.totalorder %s674_s25, 0 }
 0x193   : > { %p680_p10 = scmp.ge.s32.totalorder %s471_s15, 2  ;;  %s254_s8 = scalar_lea.sflag [#allocation4], %s253_s6 }
 0x195   : > { %p334_p2 = pnand %p680_p10, %p679_p7 }
 0x197   : > { %454 = dma.done.wait (!%p334_p2), %s254_s8, 128  }
 0x198   : > { %456 = vsyncadd (!%p334_p2), %s254_s8, 4294967168  ;;  %p16_p4 = scmp.ge.s32.totalorder %s520_s18, 4   ;;  %s681_s12 = smov %s463_s13 }
 0x199   : > { %s682_s13 = smov %s467_s14  ;;  %s683_s14 = smov %s532_s21 }
 0x19a   : > { %s684_s15 = smov %s520_s18  ;;  %18 = sbr.rel (!%p16_p4) target bundleno = 5 (0x5), region = 77 }
 0x1a1   :  { %259 = vsyncpa [#allocation3], 1 }
 0x1a2   :  { %261 = vsyncpa [#allocation3 + $0x1], 1 }
 0x1a3   :  { %262 = vsyncpa [#allocation4], 1 }
 0x1a4   :  { %264 = vsyncpa [#allocation4 + $0x1], 1 }

</bundles_post_ra>
